<compile_context>
chip_gen: v6e
topology: v6e:2x2x1
jax: 0.10.0
libtpu: 0.0.40
codegen_flags: <defaults>
</compile_context>

<pallas_src>
import math
from functools import partial

import jax
import jax.numpy as jnp
from jax import lax
from jax.experimental import pallas as pl
from jax.experimental.pallas import tpu as pltpu

KSIZE = 5  # conv kernel width
PAD = 2    # padding=2 -> "same" length output


def _attention_block_kernel(x_ref, xcol_ref, w_ref, b_ref, out_ref, *,
                            n_batch, seq_len, k_size, inv_sqrt_k):
    # x_ref   : (C, Bb*T)     residual input, batch folded into the lane axis
    # xcol_ref: (5*C, Bb*T)   im2col slab (row r = k*C + c), built in wrapper
    # w_ref   : (3*K, 5*C)    fused conv weights, rows = [keys; queries; values]
    # b_ref   : (3*K, 1)      fused conv biases
    # out_ref : (C, Bb*T)

    # All taps, all projections, all batch elements: a single MXU matmul.
    kqv = jnp.dot(w_ref[...], xcol_ref[...],
                  preferred_element_type=jnp.float32) + b_ref[...]
    keys = kqv[0:k_size, :]
    queries = kqv[k_size:2 * k_size, :]
    values = kqv[2 * k_size:3 * k_size, :]
    x2d = x_ref[...]

    # Per-batch attention: tiny (K,K) work, static unroll over Bb elements.
    for b in range(n_batch):
        lo, hi = b * seq_len, (b + 1) * seq_len
        qb = queries[:, lo:hi]
        kb = keys[:, lo:hi]
        vb = values[:, lo:hi]

        # logits[i, j] = sum_t q[i, t] * k[j, t]  (== Q @ K^T) — contract the
        # lane (time) axis directly, no transpose materialized.
        logits = lax.dot_general(qb, kb, (((1,), (1,)), ((), ())),
                                 preferred_element_type=jnp.float32)

        # torch F.softmax(logits, dim=1) on (B, K, K) == softmax over the row
        # (query) axis of each per-batch (K, K) matrix, THEN divide by
        # sqrt(k).  Unusual vs. standard scaled-dot-product attention, but it
        # faithfully matches the PyTorch reference — do not "fix" it.
        m = jnp.max(logits, axis=0, keepdims=True)
        e = jnp.exp(logits - m)
        denom = jnp.sum(e, axis=0, keepdims=True)
        # Approx reciprocal -> EUP slot; fold 1/sqrt(k) into the same multiply.
        probs = e * (pl.reciprocal(denom, approx=True) * inv_sqrt_k)

        # TODO(synk): the PyTorch forward builds a triu mask but never applies
        # it, so it is intentionally omitted here.

        read = jnp.dot(probs, vb, preferred_element_type=jnp.float32)  # (K, T)
        out_ref[:, lo:hi] = (x2d[:, lo:hi] + read).astype(out_ref.dtype)


def attention_block(x, wk, bk, wq, bq, wv, bv, *, batch_block=None):
    """x: (B, C, T); w*: (O, C, 5); b*: (O,). Returns (B, C, T)."""
    B, C, T = x.shape
    K = wk.shape[0]
    V = wv.shape[0]
    assert K == C and V == K, "module requires dims == k_size == v_size"

    Bb = B if batch_block is None else batch_block
    assert B % Bb == 0
    # Lane blocks must be the full lane extent or a multiple of 128 lanes.
    assert Bb == B or (Bb * T) % 128 == 0, "pick batch_block so Bb*T % 128 == 0"
    n_steps = B // Bb

    # ---- Glue, done once by XLA outside the kernel ----
    # im2col slab: row r = k*C + c holds x_padded[b, c, t + k]; batch folded
    # into the lane (time) axis so the kernel sees lane-dense 2-D slabs and
    # never does unaligned lane-offset slices.
    xp = jnp.pad(x, ((0, 0), (0, 0), (PAD, PAD)))                  # (B, C, T+4)
    xcol = jnp.concatenate([xp[:, :, k:k + T] for k in range(KSIZE)], axis=1)
    xcol2d = jnp.transpose(xcol, (1, 0, 2)).reshape(KSIZE * C, B * T)
    x2d = jnp.transpose(x, (1, 0, 2)).reshape(C, B * T)

    # Fused conv weights/biases: rows = [keys; queries; values], columns
    # ordered r = k*C + c to match the im2col row ordering.
    def flat(w):  # (O, C, 5) -> (O, 5*C)
        return jnp.transpose(w, (0, 2, 1)).reshape(w.shape[0], KSIZE * C)

    w_all = jnp.concatenate([flat(wk), flat(wq), flat(wv)], axis=0)  # (3K, 5C)
    b_all = jnp.concatenate([bk, bq, bv]).reshape(2 * K + V, 1)

    kernel = partial(_attention_block_kernel, n_batch=Bb, seq_len=T,
                     k_size=K, inv_sqrt_k=1.0 / math.sqrt(K))

    out2d = pl.pallas_call(
        kernel,
        out_shape=jax.ShapeDtypeStruct((C, B * T), x.dtype),
        grid_spec=pltpu.PrefetchScalarGridSpec(
            num_scalar_prefetch=0,
            grid=(n_steps,),
            in_specs=[
                pl.BlockSpec((C, Bb * T), lambda g: (0, g)),
                pl.BlockSpec((KSIZE * C, Bb * T), lambda g: (0, g)),
                pl.BlockSpec((2 * K + V, KSIZE * C), lambda g: (0, 0)),
                pl.BlockSpec((2 * K + V, 1), lambda g: (0, 0)),
            ],
            out_specs=pl.BlockSpec((C, Bb * T), lambda g: (0, g)),
        ),
        # "parallel": a multi-step batch grid can be split across v7x's 2 TCs;
        # harmless on single-TC v5e/v6e.
        compiler_params=pltpu.CompilerParams(
            dimension_semantics=("parallel",)),
    )(x2d, xcol2d, w_all, b_all)

    # Un-fold the lane-packed output back to (B, C, T).
    return jnp.transpose(out2d.reshape(C, B, T), (1, 0, 2))


def _ref_forward(x, wk, bk, wq, bq, wv, bv):
    """Pure-JAX reference matching the PyTorch module exactly."""
    K = wk.shape[0]

    def conv1d(xx, w, b):
        y = jax.lax.conv_general_dilated(
            xx, w, window_strides=(1,), padding=[(PAD, PAD)],
            dimension_numbers=("NCH", "OIH", "NCH"))
        return y + b[None, :, None]

    keys = conv1d(x, wk, bk)
    queries = conv1d(x, wq, bq)
    values = conv1d(x, wv, bv)
    logits = jnp.einsum("bkt,bjt->bkj", queries, keys)
    probs = jax.nn.softmax(logits, axis=1) / math.sqrt(K)
    read = jnp.einsum("bij,bjt->bit", probs, values)
    return x + read


if __name__ == "__main__":
    B, D, T = 2, 8, 16          # dims = k_size = v_size = 8, seq_len = 16
    key = jax.random.PRNGKey(0)
    kx, kwk, kbk, kwq, kbq, kwv, kbv = jax.random.split(key, 7)

    bound = 1.0 / math.sqrt(D * KSIZE)   # PyTorch Conv1d-style init bound
    x = jax.random.normal(kx, (B, D, T), jnp.float32)
    wk = jax.random.uniform(kwk, (D, D, KSIZE), jnp.float32, -bound, bound)
    bk = jax.random.uniform(kbk, (D,), jnp.float32, -bound, bound)
    wq = jax.random.uniform(kwq, (D, D, KSIZE), jnp.float32, -bound, bound)
    bq = jax.random.uniform(kbq, (D,), jnp.float32, -bound, bound)
    wv = jax.random.uniform(kwv, (D, D, KSIZE), jnp.float32, -bound, bound)
    bv = jax.random.uniform(kbv, (D,), jnp.float32, -bound, bound)

    out = attention_block(x, wk, bk, wq, bq, wv, bv)
    out = jax.block_until_ready(out)

    ref = _ref_forward(x, wk, bk, wq, bq, wv, bv)
    assert out.shape == (B, D, T) and out.dtype == jnp.float32
    # Tolerance relaxed from 1e-5 because the softmax denominator uses the
    # EUP approximate reciprocal (pl.reciprocal(approx=True)).
    assert jnp.allclose(out, ref, rtol=2e-3, atol=2e-3), "mismatch vs reference"

    print("KERNEL_OK")
</pallas_src>

<mosaic_0001>
module attributes {stable_mosaic.version = 11 : i64} {
  func.func @_attention_block_kernel(%arg0: i32, %arg1: memref<8x32xf32, #tpu.memory_space<vmem>>, %arg2: memref<40x32xf32, #tpu.memory_space<vmem>>, %arg3: memref<24x40xf32, #tpu.memory_space<vmem>>, %arg4: memref<24x1xf32, #tpu.memory_space<vmem>>, %arg5: memref<8x32xf32, #tpu.memory_space<vmem>>) attributes {dimension_semantics = [#tpu.dimension_semantics<parallel>], iteration_bounds = array<i64: 1>, scalar_prefetch = 0 : i64, scratch_operands = 0 : i64, tpu.core_type = #tpu.core_type<tc>, window_params = [{transform_indices = @transform_0, window_bounds = array<i64: 8, 32>}, {transform_indices = @transform_1, window_bounds = array<i64: 40, 32>}, {pipeline_mode = #tpu.pipeline_mode<synchronous>, transform_indices = @transform_2, window_bounds = array<i64: 24, 40>}, {pipeline_mode = #tpu.pipeline_mode<synchronous>, transform_indices = @transform_3, window_bounds = array<i64: 24, 1>}, {transform_indices = @transform_4, window_bounds = array<i64: 8, 32>}]} {
    %c0 = arith.constant 0 : index
    %c0_0 = arith.constant 0 : index
    %0 = vector.load %arg3[%c0, %c0_0] : memref<24x40xf32, #tpu.memory_space<vmem>>, vector<24x40xf32>
    %c0_1 = arith.constant 0 : index
    %c0_2 = arith.constant 0 : index
    %1 = vector.load %arg2[%c0_1, %c0_2] : memref<40x32xf32, #tpu.memory_space<vmem>>, vector<40x32xf32>
    %cst = arith.constant dense<0.000000e+00> : vector<24x32xf32>
    %2 = tpu.matmul %0, %1, %cst {dimension_numbers = #tpu.dot_dimension_numbers<[1], [0], [0], [1], [0, 0, 1, 1], [], []>} : vector<24x40xf32>, vector<40x32xf32>, vector<24x32xf32> -> vector<24x32xf32>
    %c0_3 = arith.constant 0 : index
    %c0_4 = arith.constant 0 : index
    %3 = vector.load %arg4[%c0_3, %c0_4] : memref<24x1xf32, #tpu.memory_space<vmem>>, vector<24x1xf32>
    %4 = vector.broadcast %3 : vector<24x1xf32> to vector<24x32xf32>
    %5 = arith.addf %2, %4 : vector<24x32xf32>
    %6 = vector.extract_strided_slice %5 {offsets = [0, 0], sizes = [8, 32], strides = [1, 1]} : vector<24x32xf32> to vector<8x32xf32>
    %7 = vector.extract_strided_slice %5 {offsets = [8, 0], sizes = [8, 32], strides = [1, 1]} : vector<24x32xf32> to vector<8x32xf32>
    %8 = vector.extract_strided_slice %5 {offsets = [16, 0], sizes = [8, 32], strides = [1, 1]} : vector<24x32xf32> to vector<8x32xf32>
    %c0_5 = arith.constant 0 : index
    %c0_6 = arith.constant 0 : index
    %9 = vector.load %arg1[%c0_5, %c0_6] : memref<8x32xf32, #tpu.memory_space<vmem>>, vector<8x32xf32>
    %10 = vector.extract_strided_slice %7 {offsets = [0, 0], sizes = [8, 16], strides = [1, 1]} : vector<8x32xf32> to vector<8x16xf32>
    %11 = vector.extract_strided_slice %6 {offsets = [0, 0], sizes = [8, 16], strides = [1, 1]} : vector<8x32xf32> to vector<8x16xf32>
    %12 = vector.extract_strided_slice %8 {offsets = [0, 0], sizes = [8, 16], strides = [1, 1]} : vector<8x32xf32> to vector<8x16xf32>
    %cst_7 = arith.constant dense<0.000000e+00> : vector<8x8xf32>
    %13 = tpu.matmul %10, %11, %cst_7 {dimension_numbers = #tpu.dot_dimension_numbers<[1], [1], [0], [0], [0, 0, 1, 0], [], []>} : vector<8x16xf32>, vector<8x16xf32>, vector<8x8xf32> -> vector<8x8xf32>
    %cst_8 = arith.constant dense<0xFF800000> : vector<8xf32>
    %14 = vector.multi_reduction <maximumf>, %13, %cst_8 [0] : vector<8x8xf32> to vector<8xf32>
    %15 = vector.shape_cast %14 : vector<8xf32> to vector<1x8xf32>
    %16 = vector.broadcast %15 : vector<1x8xf32> to vector<8x8xf32>
    %17 = arith.subf %13, %16 : vector<8x8xf32>
    %18 = math.exp %17 : vector<8x8xf32>
    %cst_9 = arith.constant dense<0.000000e+00> : vector<8xf32>
    %19 = vector.multi_reduction <add>, %18, %cst_9 [0] : vector<8x8xf32> to vector<8xf32>
    %20 = vector.shape_cast %19 : vector<8xf32> to vector<1x8xf32>
    %21 = tpu.reciprocal %20 {approx = true} : vector<1x8xf32> -> vector<1x8xf32>
    %cst_10 = arith.constant 0.353553385 : f32
    %22 = vector.broadcast %cst_10 : f32 to vector<1x8xf32>
    %23 = arith.mulf %21, %22 : vector<1x8xf32>
    %24 = vector.broadcast %23 : vector<1x8xf32> to vector<8x8xf32>
    %25 = arith.mulf %18, %24 : vector<8x8xf32>
    %cst_11 = arith.constant dense<0.000000e+00> : vector<8x16xf32>
    %26 = tpu.matmul %25, %12, %cst_11 {dimension_numbers = #tpu.dot_dimension_numbers<[1], [0], [0], [1], [0, 0, 1, 1], [], []>} : vector<8x8xf32>, vector<8x16xf32>, vector<8x16xf32> -> vector<8x16xf32>
    %27 = vector.extract_strided_slice %9 {offsets = [0, 0], sizes = [8, 16], strides = [1, 1]} : vector<8x32xf32> to vector<8x16xf32>
    %28 = arith.addf %27, %26 : vector<8x16xf32>
    %c0_12 = arith.constant 0 : index
    %c0_13 = arith.constant 0 : index
    %29 = vector.load %arg5[%c0_12, %c0_13] : memref<8x32xf32, #tpu.memory_space<vmem>>, vector<8x16xf32>
    tpu.vector_store %arg5[%c0_12, %c0_13], %28 {strides = array<i32>} : memref<8x32xf32, #tpu.memory_space<vmem>>, vector<8x16xf32>,
    %30 = vector.extract_strided_slice %7 {offsets = [0, 16], sizes = [8, 16], strides = [1, 1]} : vector<8x32xf32> to vector<8x16xf32>
    %31 = vector.extract_strided_slice %6 {offsets = [0, 16], sizes = [8, 16], strides = [1, 1]} : vector<8x32xf32> to vector<8x16xf32>
    %32 = vector.extract_strided_slice %8 {offsets = [0, 16], sizes = [8, 16], strides = [1, 1]} : vector<8x32xf32> to vector<8x16xf32>
    %cst_14 = arith.constant dense<0.000000e+00> : vector<8x8xf32>
    %33 = tpu.matmul %30, %31, %cst_14 {dimension_numbers = #tpu.dot_dimension_numbers<[1], [1], [0], [0], [0, 0, 1, 0], [], []>} : vector<8x16xf32>, vector<8x16xf32>, vector<8x8xf32> -> vector<8x8xf32>
    %cst_15 = arith.constant dense<0xFF800000> : vector<8xf32>
    %34 = vector.multi_reduction <maximumf>, %33, %cst_15 [0] : vector<8x8xf32> to vector<8xf32>
    %35 = vector.shape_cast %34 : vector<8xf32> to vector<1x8xf32>
    %36 = vector.broadcast %35 : vector<1x8xf32> to vector<8x8xf32>
    %37 = arith.subf %33, %36 : vector<8x8xf32>
    %38 = math.exp %37 : vector<8x8xf32>
    %cst_16 = arith.constant dense<0.000000e+00> : vector<8xf32>
    %39 = vector.multi_reduction <add>, %38, %cst_16 [0] : vector<8x8xf32> to vector<8xf32>
    %40 = vector.shape_cast %39 : vector<8xf32> to vector<1x8xf32>
    %41 = tpu.reciprocal %40 {approx = true} : vector<1x8xf32> -> vector<1x8xf32>
    %cst_17 = arith.constant 0.353553385 : f32
    %42 = vector.broadcast %cst_17 : f32 to vector<1x8xf32>
    %43 = arith.mulf %41, %42 : vector<1x8xf32>
    %44 = vector.broadcast %43 : vector<1x8xf32> to vector<8x8xf32>
    %45 = arith.mulf %38, %44 : vector<8x8xf32>
    %cst_18 = arith.constant dense<0.000000e+00> : vector<8x16xf32>
    %46 = tpu.matmul %45, %32, %cst_18 {dimension_numbers = #tpu.dot_dimension_numbers<[1], [0], [0], [1], [0, 0, 1, 1], [], []>} : vector<8x8xf32>, vector<8x16xf32>, vector<8x16xf32> -> vector<8x16xf32>
    %47 = vector.extract_strided_slice %9 {offsets = [0, 16], sizes = [8, 16], strides = [1, 1]} : vector<8x32xf32> to vector<8x16xf32>
    %48 = arith.addf %47, %46 : vector<8x16xf32>
    %c0_19 = arith.constant 0 : index
    %c16 = arith.constant 16 : index
    %49 = vector.load %arg5[%c0_19, %c16] : memref<8x32xf32, #tpu.memory_space<vmem>>, vector<8x16xf32>
    tpu.vector_store %arg5[%c0_19, %c16], %48 {strides = array<i32>} : memref<8x32xf32, #tpu.memory_space<vmem>>, vector<8x16xf32>,
    return
  }
  func.func @transform_0(%arg0: i32) -> (i32, i32) {
    %c0_i32 = arith.constant 0 : i32
    %c0_i32_0 = arith.constant 0 : i32
    return %c0_i32, %arg0 : i32, i32
  }
  func.func @transform_1(%arg0: i32) -> (i32, i32) {
    %c0_i32 = arith.constant 0 : i32
    %c0_i32_0 = arith.constant 0 : i32
    return %c0_i32, %arg0 : i32, i32
  }
  func.func @transform_2(%arg0: i32) -> (i32, i32) {
    %c0_i32 = arith.constant 0 : i32
    %c0_i32_0 = arith.constant 0 : i32
    %c0_i32_1 = arith.constant 0 : i32
    return %c0_i32, %c0_i32_0 : i32, i32
  }
  func.func @transform_3(%arg0: i32) -> (i32, i32) {
    %c0_i32 = arith.constant 0 : i32
    %c0_i32_0 = arith.constant 0 : i32
    %c0_i32_1 = arith.constant 0 : i32
    return %c0_i32, %c0_i32_0 : i32, i32
  }
  func.func @transform_4(%arg0: i32) -> (i32, i32) {
    %c0_i32 = arith.constant 0 : i32
    %c0_i32_0 = arith.constant 0 : i32
    return %c0_i32, %arg0 : i32, i32
  }
}

</mosaic_0001>

<bundles_post_ra>
// kernel: tpu_custom_call.1
= control target key start
LH: loop header
LB: loop body
LE: loop exit
PB: predicated region body
PF: predicated region fallthrough
CT: control target
= control target key end

     0   :  { %v606_v1 = vmov 0.0   ;;  %vm607_vm0 = vmmov 0   ;;  %v608_v3 = vmov 0   ;;  %s710_s0 = inlined_call_operand.vmem [shape: f32[8,32], index: 0, kind: input, shape index: {}]   ;;  %s711_s1 = inlined_call_operand.vmem [shape: f32[40,32], index: 1, kind: input, shape index: {}]   ;;  %s712_s2 = inlined_call_operand.vmem [shape: f32[24,40], index: 2, kind: input, shape index: {}]   ;;  %s713_s3 = inlined_call_operand.vmem [shape: f32[24,1], index: 3, kind: input, shape index: {}]   ;;  %s714_s4 = inlined_call_operand.hbm [shape: f32[8,32], index: 4, kind: output, shape index: {}]  }
   0x1   :  { %v25_v0 = vld [vmem:[%s711_s1 + $0x20] sm:$0xff]  ;;  %529 = vmatprep.subr.mxu0 %v606_v1  ;;  %v24_v2 = vld [vmem:[%s711_s1 + $0x18] sm:$0xff]  ;;  %539 = vmatprep.mubr.msk.f32.mxu0 %vm607_vm0, %v606_v1  ;;  %v23_v5 = vld [vmem:[%s711_s1 + $0x10] sm:$0xff] }
   0x2   :  { %530 = vmatpush3.msra.mxu0 %v25_v0  ;;  %574 = vset.pattern.permute.xlu0 %v608_v3  ;;  %v26_v4 = vld [vmem:[%s713_s3] sm:$0xff]  ;;  %v28_v6 = vld [vmem:[%s713_s3 + $0x10] sm:$0xff] }
   0x3   :  { %531 = vmatprep.subr.mxu0 %v606_v1  ;;  %31 = vperm.xlu0 %574, %v26_v4  }
   0x4   :  { %9 = vsyncpa [#allocation3], 0  ;;  %532 = vmatpush3.msra.mxu0 %v24_v2  ;;  %v27_v7 = vld [vmem:[%s713_s3 + $0x8] sm:$0xff]  ;;  %575 = vset.pattern.permute.xlu1 %v608_v3  ;;  %v21_v9 = vld [vmem:[%s711_s1] sm:$0xff]  ;;  %vm44_vm1 = vcmask 326656   ;;  %vm135_vm2 = vcmask 130048  }
   0x5   :  { %533 = vmatprep.subr.mxu0 %v606_v1  ;;  %v22_v8 = vld [vmem:[%s711_s1 + $0x8] sm:$0xff]  ;;  %41 = vperm.xlu1 %575, %v28_v6   ;;  %v18_v10 = vld [vmem:[%s712_s2] sm:$0xff]  ;;  %v20_v12 = vld [vmem:[%s712_s2 + $0x10] sm:$0xff]  ;;  %s609_s9 = smov 112   ;;  %vm212_vm3 = vcmask 64512   ;;  %s611_s11 = smov [#allocation2]  }
   0x6   :  { %534 = vmatpush3.msra.mxu0 %v23_v5  ;;  %548 = vmatprep.subr.mxu1 %v606_v1  ;;  %v19_v11 = vld [vmem:[%s712_s2 + $0x8] sm:$0xff]  ;;  %v134_v50 = vld [vmem:[%s710_s0] sm:$0xff]  ;;  %s610_s0 = smov 16   ;;  %s496_s12 = sshll.u32 %s611_s11, 4  ;;  %vm488_vm4 = vcmask 261248   ;;  %s497_s12 = int_to_ptr.vmem [resolvable:$true] %s496_s12 }
   0x7   :  { %535 = vmatprep.subr.mxu0 %v606_v1  ;;  %36 = vperm.xlu0 %574, %v27_v7   ;;  %s584_s13 = scalar_lea.vmem %s497_s12, 128  ;;  %p589_p1 = scmp.lt.s32.totalorder %s497_s12, %s497_s12 }
   0x8   :  { %536 = vmatpush3.msra.mxu0 %v22_v8  ;;  %550 = vmatprep.mubr.msk.f32.mxu1 %vm607_vm0, %v606_v1  ;;  %p585_p0 = scmp.ne.s32.totalorder %s497_s12, %s584_s13  ;;  %p590_p2 = scmp.lt.s32.totalorder %s584_s13, %s584_s13 }
   0x9   :  { %537 = vmatprep.subr.mxu0 %v606_v1 }
   0xa   :  { %538 = vmatpush3.msra.mxu0 %v21_v9  ;;  %p591_p3 = por %p590_p2, %p589_p1 }
   0xb   :  { %540 = vmatmul.mubr.msk.f32.vlgmr.msra.gmra.mxu0 %vm44_vm1, %v18_v10 }
   0xc   :  { %542 = vmatprep.mubr.msk.f32.mxu0 %vm607_vm0, %v606_v1  ;;  %p592_p4 = pnand %p591_p3, %p585_p0 }
   0xf   :  { %543 = vmatmul.mubr.msk.f32.gmra.mxu0 %vm44_vm1, %v19_v11 }
  0x10   :  { %545 = vmatprep.mubr.msk.f32.mxu0 %vm607_vm0, %v606_v1 }
  0x13   :  { %546 = vmatmul.mubr.msk.f32.gmra.mxu0 %vm44_vm1, %v20_v12 }
  0x7e   :  { %v32_v13 = vpop.permute.xlu0 %31 }
  0x80   :  { %v42_v21 = vpop.permute.xlu1 %41 }
  0x82   :  { %v37_v17 = vpop.permute.xlu0 %36 }
  0xcb   :  { %v120_v14 = vpop.f32.mrf.mxu0 }
  0xcc   :  { %v121_v15 = vadd.f32 %v120_v14, %v32_v13 }
  0xcd   :  { %v541_v16 = vpop.f32.mrf.mxu0 }
  0xce   :  { %310 = vrot.lane.b32.xlu1 %v121_v15, %s609_s9  ;;  %549 = vmatpush3.xpose.msk.msra.mxu1 %vm135_vm2, %v121_v15 }
  0xcf   :  { %v125_v18 = vpop.f32.mrf.mxu0  ;;  %553 = vmatprep.subr.mxu1 %v606_v1 }
  0xd0   :  { %v126_v19 = vadd.f32 %v125_v18, %v37_v17 }
  0xd1   :  { %v544_v20 = vpop.f32.mrf.mxu0 }
  0xd2   :  { %308 = vrot.lane.b32.xlu0 %v126_v19, %s609_s9  ;;  %551 = vmatmul.mubr.msk.f32.vlgmr.msra.gmra.mxu1 %vm135_vm2, %v126_v19 }
  0xd3   :  { %555 = vmatprep.mubr.msk.f32.mxu1 %vm607_vm0, %v606_v1  ;;  %v130_v22 = vpop.f32.mrf.mxu0 }
  0xd4   :  { %v131_v23 = vadd.f32 %v130_v22, %v42_v21 }
  0xd5   :  { %v547_v24 = vpop.f32.mrf.mxu0 }
  0xd6   :  { %407 = vrot.lane.b32.xlu1 %v131_v23, %s609_s9  ;;  %554 = vmatpush3.msra.mxu1 %v131_v23 }
  0xd7   :  { %558 = vmatprep.subr.mxu1 %v606_v1 }
 0x140   :  { %v311_v46 = vpop.permute.xlu1 %310 }
 0x144   :  { %v309_v49 = vpop.permute.xlu0 %308 }
 0x148   :  { %v408_v48 = vpop.permute.xlu1 %407 }
 0x192   :  { %v208_v25 = vpop.f32.mrf.mxu1 }
 0x193   :  { %v213_v26 = vsel %vm212_vm3, %v208_v25, -inf }
 0x194   :  { %v214_v27 = vrot.slane %v213_v26, 4  ;;  %v552_v28 = vpop.f32.mrf.mxu1 }
 0x196   :  { %v215_v29 = vmax.f32 %v213_v26, %v214_v27 }
 0x198   :  { %v216_v30 = vrot.slane %v215_v29, 2 }
 0x19a   :  { %v217_v31 = vmax.f32 %v215_v29, %v216_v30 }
 0x19c   :  { %v218_v32 = vrot.slane %v217_v31, 1 }
 0x19e   :  { %v219_v33 = vmax.f32 %v217_v31, %v218_v32 }
 0x1a0   :  { %v220_v34 = vsub.f32 %v208_v25, %v219_v33 }
 0x1a2   :  { %v221_v35 = vmul.f32 1.442695, %v220_v34 }
 0x1a4   :  { %576 = vpow2.f32 %v221_v35 }
 0x1b1   :  { %v577_v36 = vpop.eup %576 }
 0x1b2   :  { %v223_v37 = vsel %vm212_vm3, %v577_v36, 0.0 }
 0x1b3   :  { %v224_v38 = vrot.slane %v223_v37, 4 }
 0x1b5   :  { %v225_v39 = vadd.f32 %v224_v38, %v223_v37 }
 0x1b7   :  { %v226_v40 = vrot.slane %v225_v39, 2 }
 0x1b9   :  { %v227_v41 = vadd.f32 %v226_v40, %v225_v39 }
 0x1bb   :  { %v228_v42 = vrot.slane %v227_v41, 1 }
 0x1bd   :  { %v229_v43 = vadd.f32 %v228_v42, %v227_v41 }
 0x1bf   :  { %578 = vrcp.f32 %v229_v43 }
 0x1cc   :  { %v579_v44 = vpop.eup %578 }
 0x1cd   :  { %v231_v45 = vmul.f32 0.35355338, %v579_v44 }
 0x1cf   :  { %v232_v47 = vmul.f32 %v577_v36, %v231_v45 }
 0x1d1   :  { %556 = vmatmul.mubr.msk.f32.vlgmr.msra.gmra.mxu1 %vm212_vm3, %v232_v47 }
 0x1d2   :  { %559 = vmatpush3.xpose.msk.msra.mxu1 %vm135_vm2, %v311_v46  ;;  %560 = vmatprep.mubr.msk.f32.mxu1 %vm607_vm0, %v606_v1 }
 0x1d3   :  { %563 = vmatprep.subr.mxu1 %v606_v1 }
 0x1d5   :  { %561 = vmatmul.mubr.msk.f32.vlgmr.msra.gmra.mxu1 %vm135_vm2, %v309_v49 }
 0x1d6   :  { %564 = vmatpush3.msra.mxu1 %v408_v48  ;;  %565 = vmatprep.mubr.msk.f32.mxu1 %vm607_vm0, %v606_v1 }
 0x291   :  { %v302_v51 = vpop.f32.mrf.mxu1 }
 0x292   :  { %v306_v52 = vadd.f32 %v302_v51, %v134_v50 }
 0x293   :  { %v557_v53 = vpop.f32.mrf.mxu1 }
 0x294   :  { %307 = vst.msk [vmem:[#allocation2] sm:$0xff] %vm135_vm2, %v306_v52 }
 0x295   :  { %v382_v54 = vpop.f32.mrf.mxu1 }
 0x296   :  { %v386_v55 = vsel %vm212_vm3, %v382_v54, -inf }
 0x297   :  { %v387_v56 = vrot.slane %v386_v55, 4  ;;  %v562_v57 = vpop.f32.mrf.mxu1 }
 0x299   :  { %v388_v58 = vmax.f32 %v386_v55, %v387_v56 }
 0x29b   :  { %v389_v59 = vrot.slane %v388_v58, 2 }
 0x29d   :  { %v390_v60 = vmax.f32 %v388_v58, %v389_v59 }
 0x29f   :  { %v391_v61 = vrot.slane %v390_v60, 1 }
 0x2a1   :  { %v392_v62 = vmax.f32 %v390_v60, %v391_v61 }
 0x2a3   :  { %v393_v63 = vsub.f32 %v382_v54, %v392_v62 }
 0x2a5   :  { %v394_v0 = vmul.f32 1.442695, %v393_v63 }
 0x2a7   :  { %580 = vpow2.f32 %v394_v0 }
 0x2b4   :  { %v581_v1 = vpop.eup %580 }
 0x2b5   :  { %v396_v2 = vsel %vm212_vm3, %v581_v1, 0.0 }
 0x2b6   :  { %v397_v3 = vrot.slane %v396_v2, 4 }
 0x2b8   :  { %v398_v4 = vadd.f32 %v397_v3, %v396_v2 }
 0x2ba   :  { %v399_v5 = vrot.slane %v398_v4, 2 }
 0x2bc   :  { %v400_v6 = vadd.f32 %v399_v5, %v398_v4 }
 0x2be   :  { %v401_v7 = vrot.slane %v400_v6, 1 }
 0x2c0   :  { %v402_v8 = vadd.f32 %v401_v7, %v400_v6 }
 0x2c2   :  { %582 = vrcp.f32 %v402_v8 }
 0x2cf   :  { %v583_v9 = vpop.eup %582 }
 0x2d0   :  { %v404_v10 = vmul.f32 0.35355338, %v583_v9 }
 0x2d2   :  { %v405_v11 = vmul.f32 %v581_v1, %v404_v10 }
 0x2d4   :  { %566 = vmatmul.mubr.msk.f32.vlgmr.msra.gmra.mxu1 %vm212_vm3, %v405_v11 }
 0x394   :  { %v479_v12 = vpop.f32.mrf.mxu1 }
 0x395   :  { %484 = vrot.lane.b32.xlu0 %v479_v12, %s610_s0 }
 0x396   :  { %v567_v13 = vpop.f32.mrf.mxu1 }
 0x407   :  { %v485_v14 = vpop.permute.xlu0 %484 }
 0x408   :  { %v487_v15 = vadd.f32 %v485_v14, %v134_v50 }
 0x40a   :  { %489 = vst.msk [vmem:[#allocation2] sm:$0xff] %vm488_vm4, %v487_v15 }
 0x40b   :  { %595 = shalt.err (!%p592_p4)
}
 0x40c   :  { %499 = dma.vmem_to_hbm [thread:$0]  %s497_s12, 128, %s714_s4, [#allocation3]  }
 0x40d   :  { %604 = dma.done.wait [#allocation3], 128  }
 0x40e   :  { %605 = vsyncadd [#allocation3], 4294967168 }
 0x40f   :  { %503 = vsyncpa [#allocation3], 1 }

</bundles_post_ra>
